<compile_context>
chip_gen: v5e
topology: v5e:2x2
jax: 0.10.0
libtpu: 0.0.40
codegen_flags: <defaults>
</compile_context>

<pallas_src>
import jax
import jax.numpy as jnp
from jax.experimental import pallas as pl
from jax.experimental.pallas import tpu as pltpu


def _identity_kernel(x_ref, o_ref):
    # Pure pass-through: copy the current VMEM tile to the output tile.
    o_ref[...] = x_ref[...]


_LANE_CANDIDATES = (8192, 4096, 2048, 1024, 512, 256, 128)  # widest lane-dense cols first
_TARGET_BLOCK_BYTES = 4 * 1024 * 1024  # ~4 MiB/block: 2(dbl-buf) x 2(in+out) x 4 MiB
                                       # = 16 MiB pipelined VMEM, safe on v5e/v6e/v7x.


def _pick_tile_rows(rows: int, cols: int, itemsize: int) -> int:
    """Row-block sized for ~_TARGET_BLOCK_BYTES, multiple of 32 rows."""
    target = max(32, (_TARGET_BLOCK_BYTES // (cols * itemsize)) // 32 * 32)
    if target >= rows:
        return rows  # single block; block dim == full array dim is always legal
    # Prefer an exact divisor of `rows` near the target (avoids a masked
    # partial-store tail block), but never shrink below half the target.
    for cand in range(target, max(32, target // 2) - 1, -32):
        if rows % cand == 0:
            return cand
    return target  # ragged tail handled by Pallas masking


def straight_through(x: jax.Array, *, donate_input: bool = False) -> jax.Array:
    """StraightThrough.forward (identity), as a lane-dense Pallas TPU copy."""
    n = x.size
    if n == 0 or (n % 128) != 0:
        # Identity needs no data movement; for ragged sizes returning the
        # input untouched is the optimal "kernel" (zero HBM traffic).
        return x

    # Widest lane count that divides the flat size exactly -> only
    # metadata reshapes on either side of the pallas_call.
    cols = next(c for c in _LANE_CANDIDATES if n % c == 0)
    rows = n // cols
    itemsize = jnp.dtype(x.dtype).itemsize

    tile_rows = _pick_tile_rows(rows, cols, itemsize)
    grid = (pl.cdiv(rows, tile_rows),)

    block_bytes = tile_rows * cols * itemsize
    # Cover 2 buffers x (in+out) x block plus headroom; >= 16 MiB (v5e default),
    # capped at 32 MiB (<= every generation's scoped VMEM budget).
    vmem_limit = min(max(4 * block_bytes + (4 << 20), 16 << 20), 32 << 20)

    flat = x.reshape(rows, cols)
    out = pl.pallas_call(
        _identity_kernel,
        out_shape=jax.ShapeDtypeStruct((rows, cols), x.dtype),
        grid_spec=pltpu.PrefetchScalarGridSpec(
            num_scalar_prefetch=0,
            grid=grid,
            in_specs=[pl.BlockSpec((tile_rows, cols), lambda i: (i, 0))],
            out_specs=pl.BlockSpec((tile_rows, cols), lambda i: (i, 0)),
        ),
        compiler_params=pltpu.CompilerParams(
            dimension_semantics=("parallel",),
            vmem_limit_bytes=vmem_limit,
        ),
        cost_estimate=pl.CostEstimate(
            flops=0,
            transcendentals=0,
            bytes_accessed=2 * n * itemsize,
        ),
        input_output_aliases=({0: 0} if donate_input else {}),
    )(flat)

    return out.reshape(x.shape)


if __name__ == "__main__":
    key = jax.random.PRNGKey(0)
    # Small NCHW input consistent with typical conv activations.
    x = jax.random.normal(key, (2, 4, 16, 16), dtype=jnp.float32)

    y = straight_through(x)
    y = jax.block_until_ready(y)

    assert y.shape == x.shape and y.dtype == x.dtype
    assert bool(jnp.all(y == x))
    print("KERNEL_OK")
</pallas_src>

<mosaic_0001>
module attributes {stable_mosaic.version = 11 : i64} {
  func.func @_identity_kernel(%arg0: i32, %arg1: memref<1x2048xf32, #tpu.memory_space<vmem>>, %arg2: memref<1x2048xf32, #tpu.memory_space<vmem>>) attributes {dimension_semantics = [#tpu.dimension_semantics<parallel>], iteration_bounds = array<i64: 1>, scalar_prefetch = 0 : i64, scratch_operands = 0 : i64, tpu.core_type = #tpu.core_type<tc>, window_params = [{transform_indices = @transform_0, window_bounds = array<i64: 1, 2048>}, {transform_indices = @transform_1, window_bounds = array<i64: 1, 2048>}]} {
    %c0 = arith.constant 0 : index
    %c0_0 = arith.constant 0 : index
    %0 = vector.load %arg1[%c0, %c0_0] : memref<1x2048xf32, #tpu.memory_space<vmem>>, vector<1x2048xf32>
    %c0_1 = arith.constant 0 : index
    %c0_2 = arith.constant 0 : index
    %1 = vector.load %arg2[%c0_1, %c0_2] : memref<1x2048xf32, #tpu.memory_space<vmem>>, vector<1x2048xf32>
    tpu.vector_store %arg2[%c0_1, %c0_2], %0 {strides = array<i32>} : memref<1x2048xf32, #tpu.memory_space<vmem>>, vector<1x2048xf32>,
    return
  }
  func.func @transform_0(%arg0: i32) -> (i32, i32) {
    %c0_i32 = arith.constant 0 : i32
    %c0_i32_0 = arith.constant 0 : i32
    return %arg0, %c0_i32 : i32, i32
  }
  func.func @transform_1(%arg0: i32) -> (i32, i32) {
    %c0_i32 = arith.constant 0 : i32
    %c0_i32_0 = arith.constant 0 : i32
    return %arg0, %c0_i32 : i32, i32
  }
}

</mosaic_0001>

<bundles_post_ra>
// kernel: tpu_custom_call.1
= control target key start
LH: loop header
LB: loop body
LE: loop exit
PB: predicated region body
PF: predicated region fallthrough
CT: control target
= control target key end

     0   :  { %6 = vsyncpa [#allocation3], 0  ;;  %s116_s0 = inlined_call_operand.hbm [shape: f32[1,2048], index: 0, kind: input, shape index: {}]   ;;  %s117_s1 = inlined_call_operand.hbm [shape: f32[1,2048], index: 1, kind: output, shape index: {}]  }
   0x1   :  { %7 = vsyncpa [#allocation4], 0  ;;  %s13_s8 = sshll.u32 %s116_s0, 4  ;;  %s98_s9 = smov [#allocation2]   ;;  %s14_s8 = int_to_ptr.hbm [resolvable:$true] %s13_s8 }
   0x2   :  { %s15_s10 = sshll.u32 %s98_s9, 4  ;;  %s16_s10 = int_to_ptr.vmem [resolvable:$true] %s15_s10 }
   0x3   :  { %18 = dma.hbm_to_vmem [thread:$0]  %s14_s8, 256, %s16_s10, [#allocation3]  }
   0x4   :  { %94 = dma.done.wait [#allocation3], 256  }
   0x5   :  { %95 = vsyncadd [#allocation3], 4294967040  ;;  %s99_s11 = smov [#allocation5]   ;;  %s34_s15 = sshll.u32 %s117_s1, 4  ;;  %v23_v0 = vld [vmem:[#allocation2] sm:$0xff]  ;;  %v24_v1 = vld [vmem:[#allocation2 + $0x8] sm:$0xff]  ;;  %s35_s15 = int_to_ptr.hbm [resolvable:$true] %s34_s15 }
   0x6   :  { %s32_s12 = sshll.u32 %s99_s11, 4  ;;  %25 = vst [vmem:[#allocation5] sm:$0xff] %v23_v0  ;;  %s33_s12 = int_to_ptr.vmem [resolvable:$true] %s32_s12 }
   0x7   :  { %26 = vst [vmem:[#allocation5 + $0x8] sm:$0xff] %v24_v1 }
   0x8   :  { %37 = dma.vmem_to_hbm [thread:$0]  %s33_s12, 256, %s35_s15, [#allocation4]  }
   0x9   :  { %96 = dma.done.wait [#allocation4], 256  }
   0xa   :  { %97 = vsyncadd [#allocation4], 4294967040 }
   0xb   :  { %42 = vsyncpa [#allocation3], 1 }
   0xc   :  { %43 = vsyncpa [#allocation4], 1 }

</bundles_post_ra>
